<compile_context>
chip_gen: v7x
topology: tpu7x:2x2x1
jax: 0.10.0
libtpu: 0.0.40
codegen_flags: <defaults>
</compile_context>

<pallas_src>
import functools

import jax
import jax.numpy as jnp
from jax import lax
from jax.experimental import pallas as pl
from jax.experimental.pallas import tpu as pltpu


def _round_up(a, b):
    return ((a + b - 1) // b) * b


# ----------------------------------------------------------------------------
# Fused kernel: d2 tile (MXU) + multi-bandwidth exp-sum, fully in VMEM/vregs.
# ----------------------------------------------------------------------------
def _rbf_fused_kernel(scales_ref, xa_ref, xb_ref, asq_ref, bsq_ref, o_ref,
                      *, n_kernels, use_squaring):
    xa = xa_ref[...]                                   # (tm, D)
    xb = xb_ref[...]                                   # (tn, D)
    # Contract the feature axis of both operands directly on the MXU
    # (avoids materializing a transposed copy of xb through the XLU).
    cross = lax.dot_general(
        xa, xb,
        dimension_numbers=(((1,), (1,)), ((), ())),
        preferred_element_type=jnp.float32)            # (tm, tn)
    d2 = asq_ref[...] + bsq_ref[...] - 2.0 * cross     # ||xi||^2+||xj||^2-2xi.xj
    d2 = jnp.maximum(d2, 0.0)                          # clamp tiny negatives

    if use_squaring:
        # Multipliers form a geometric series in 2: take the exp with the
        # LARGEST multiplier (smallest-magnitude exponent) once, then obtain
        # the remaining terms by repeated squaring on the VPU.
        t = jnp.exp(d2 * scales_ref[n_kernels - 1])    # scale = -1/(bw*m_max)
        acc = t
        cur = t
        for _ in range(n_kernels - 1):
            cur = cur * cur
            acc = acc + cur
    else:
        acc = jnp.exp(d2 * scales_ref[0])
        for k in range(1, n_kernels):
            acc = acc + jnp.exp(d2 * scales_ref[k])

    o_ref[...] = acc


# ----------------------------------------------------------------------------
# RBFKernel forward (wrapper == the nn.Module forward)
# ----------------------------------------------------------------------------
def make_bandwidth_multipliers(n_kernels=5, mul_factor=2.0):
    # mul_factor ** (arange(n_kernels) - n_kernels // 2)
    exps = jnp.arange(n_kernels, dtype=jnp.float32) - (n_kernels // 2)
    return jnp.power(jnp.float32(mul_factor), exps)


def rbf_kernel_forward(x, *, n_kernels=5, mul_factor=2.0, bandwidth=None,
                       tile=256):
    x = x.astype(jnp.float32)
    n, d = x.shape
    mult = make_bandwidth_multipliers(n_kernels, mul_factor)

    xsq = jnp.sum(x * x, axis=1)                       # (N,)  ||x_i||^2

    if bandwidth is None:
        # sum_ij ||xi - xj||^2 == 2*N*sum_i||x_i||^2 - 2*||sum_i x_i||^2
        # (O(N*D) in the wrapper instead of an N^2 reduction pass).
        col_sum = jnp.sum(x, axis=0)
        total = 2.0 * n * jnp.sum(xsq) - 2.0 * jnp.sum(col_sum * col_sum)
        bw = total / jnp.float32(n * n - n)
    else:
        bw = jnp.float32(bandwidth)

    # Hoisted per-bandwidth scales: exp(-d2/(bw*m_k)) == exp(d2 * s_k).
    scales = (-1.0 / (bw * mult)).astype(jnp.float32)  # (n_kernels,)

    # Tile selection: big tiles for HBM-roofline efficiency, but keep >=2
    # blocks on the leading (parallel) grid axis when possible so v7x can
    # shard across its two TensorCores.
    tile = int(tile)
    while tile > 128 and _round_up(n, tile) < 2 * tile:
        tile //= 2
    n_pad = _round_up(n, tile)
    tm = tn = tile

    if n_pad != n:
        x_p = jnp.pad(x, ((0, n_pad - n), (0, 0)))
        xsq_p = jnp.pad(xsq, (0, n_pad - n))
    else:
        x_p, xsq_p = x, xsq
    row_sq = xsq_p[:, None]                            # (n_pad, 1)
    col_sq = xsq_p[None, :]                            # (1, n_pad)

    use_squaring = (float(mul_factor) == 2.0) and n_kernels > 1

    out = pl.pallas_call(
        functools.partial(_rbf_fused_kernel, n_kernels=n_kernels,
                          use_squaring=use_squaring),
        out_shape=jax.ShapeDtypeStruct((n_pad, n_pad), jnp.float32),
        grid_spec=pltpu.PrefetchScalarGridSpec(
            num_scalar_prefetch=0,
            grid=(n_pad // tm, n_pad // tn),
            in_specs=[
                pl.BlockSpec(memory_space=pltpu.MemorySpace.SMEM),  # scales
                pl.BlockSpec((tm, d), lambda i, j: (i, 0)),         # X row tile
                pl.BlockSpec((tn, d), lambda i, j: (j, 0)),         # X col tile
                pl.BlockSpec((tm, 1), lambda i, j: (i, 0)),         # row |x|^2
                pl.BlockSpec((1, tn), lambda i, j: (0, j)),         # col |x|^2
            ],
            out_specs=pl.BlockSpec((tm, tn), lambda i, j: (i, j)),
        ),
        compiler_params=pltpu.CompilerParams(
            dimension_semantics=("parallel", "parallel"),
        ),
    )(scales, x_p, x_p, row_sq, col_sq)

    if n_pad != n:
        out = out[:n, :n]
    return out


# ----------------------------------------------------------------------------
# Pure-JAX reference (difference-based d2) for the correctness check.
# ----------------------------------------------------------------------------
def rbf_kernel_ref(x, *, n_kernels=5, mul_factor=2.0, bandwidth=None):
    x = x.astype(jnp.float32)
    n = x.shape[0]
    diff = x[:, None, :] - x[None, :, :]
    d2 = jnp.sum(diff * diff, axis=-1)
    mult = make_bandwidth_multipliers(n_kernels, mul_factor)
    bw = jnp.sum(d2) / (n * n - n) if bandwidth is None else jnp.float32(bandwidth)
    return jnp.exp(-d2[None, ...] / (bw * mult)[:, None, None]).sum(axis=0)


if __name__ == "__main__":
    key = jax.random.PRNGKey(0)
    N, D = 256, 32                        # N samples, D features
    x = jax.random.normal(key, (N, D), dtype=jnp.float32)

    out = rbf_kernel_forward(x)           # (N, N)
    out = jax.block_until_ready(out)

    ref = rbf_kernel_ref(x)
    assert out.shape == (N, N)
    assert jnp.allclose(out, ref, rtol=1e-4, atol=1e-4), (
        float(jnp.max(jnp.abs(out - ref)))
    )

    # Also exercise a non-tile-multiple N and an explicit bandwidth.
    x2 = jax.random.normal(jax.random.PRNGKey(1), (130, D), dtype=jnp.float32)
    out2 = jax.block_until_ready(rbf_kernel_forward(x2, bandwidth=3.0))
    ref2 = rbf_kernel_ref(x2, bandwidth=3.0)
    assert out2.shape == (130, 130)
    assert jnp.allclose(out2, ref2, rtol=1e-4, atol=1e-4), (
        float(jnp.max(jnp.abs(out2 - ref2)))
    )

    print("KERNEL_OK")
</pallas_src>

<mosaic_0001>
module attributes {stable_mosaic.version = 11 : i64} {
  func.func @_rbf_fused_kernel(%arg0: i32, %arg1: i32, %arg2: memref<5xf32, #tpu.memory_space<smem>>, %arg3: memref<128x32xf32, #tpu.memory_space<vmem>>, %arg4: memref<128x32xf32, #tpu.memory_space<vmem>>, %arg5: memref<128x1xf32, #tpu.memory_space<vmem>>, %arg6: memref<1x128xf32, #tpu.memory_space<vmem>>, %arg7: memref<128x128xf32, #tpu.memory_space<vmem>>) attributes {dimension_semantics = [#tpu.dimension_semantics<parallel>, #tpu.dimension_semantics<parallel>], iteration_bounds = array<i64: 2, 2>, scalar_prefetch = 0 : i64, scratch_operands = 0 : i64, tpu.core_type = #tpu.core_type<tc>, window_params = [{transform_indices = @transform_0, window_bounds = array<i64: 5>}, {transform_indices = @transform_1, window_bounds = array<i64: 128, 32>}, {transform_indices = @transform_2, window_bounds = array<i64: 128, 32>}, {transform_indices = @transform_3, window_bounds = array<i64: 128, 1>}, {transform_indices = @transform_4, window_bounds = array<i64: 1, 128>}, {transform_indices = @transform_5, window_bounds = array<i64: 128, 128>}]} {
    %c0 = arith.constant 0 : index
    %c0_0 = arith.constant 0 : index
    %0 = vector.load %arg3[%c0, %c0_0] : memref<128x32xf32, #tpu.memory_space<vmem>>, vector<128x32xf32>
    %c0_1 = arith.constant 0 : index
    %c0_2 = arith.constant 0 : index
    %1 = vector.load %arg4[%c0_1, %c0_2] : memref<128x32xf32, #tpu.memory_space<vmem>>, vector<128x32xf32>
    %cst = arith.constant dense<0.000000e+00> : vector<128x128xf32>
    %2 = tpu.matmul %0, %1, %cst {dimension_numbers = #tpu.dot_dimension_numbers<[1], [1], [0], [0], [0, 0, 1, 0], [], []>} : vector<128x32xf32>, vector<128x32xf32>, vector<128x128xf32> -> vector<128x128xf32>
    %c0_3 = arith.constant 0 : index
    %c0_4 = arith.constant 0 : index
    %3 = vector.load %arg5[%c0_3, %c0_4] : memref<128x1xf32, #tpu.memory_space<vmem>>, vector<128x1xf32>
    %c0_5 = arith.constant 0 : index
    %c0_6 = arith.constant 0 : index
    %4 = vector.load %arg6[%c0_5, %c0_6] : memref<1x128xf32, #tpu.memory_space<vmem>>, vector<1x128xf32>
    %5 = vector.broadcast %3 : vector<128x1xf32> to vector<128x128xf32>
    %6 = vector.broadcast %4 : vector<1x128xf32> to vector<128x128xf32>
    %7 = arith.addf %5, %6 : vector<128x128xf32>
    %cst_7 = arith.constant 2.000000e+00 : f32
    %8 = vector.broadcast %cst_7 : f32 to vector<128x128xf32>
    %9 = arith.mulf %8, %2 : vector<128x128xf32>
    %10 = arith.subf %7, %9 : vector<128x128xf32>
    %cst_8 = arith.constant 0.000000e+00 : f32
    %11 = vector.broadcast %cst_8 : f32 to vector<128x128xf32>
    %12 = arith.maximumf %10, %11 : vector<128x128xf32>
    %c4 = arith.constant 4 : index
    %13 = memref.load %arg2[%c4] : memref<5xf32, #tpu.memory_space<smem>>
    %14 = vector.broadcast %13 : f32 to vector<128x128xf32>
    %15 = arith.mulf %12, %14 : vector<128x128xf32>
    %16 = math.exp %15 : vector<128x128xf32>
    %17 = arith.mulf %16, %16 : vector<128x128xf32>
    %18 = arith.addf %16, %17 : vector<128x128xf32>
    %19 = arith.mulf %17, %17 : vector<128x128xf32>
    %20 = arith.addf %18, %19 : vector<128x128xf32>
    %21 = arith.mulf %19, %19 : vector<128x128xf32>
    %22 = arith.addf %20, %21 : vector<128x128xf32>
    %23 = arith.mulf %21, %21 : vector<128x128xf32>
    %24 = arith.addf %22, %23 : vector<128x128xf32>
    %c0_9 = arith.constant 0 : index
    %c0_10 = arith.constant 0 : index
    %25 = vector.load %arg7[%c0_9, %c0_10] : memref<128x128xf32, #tpu.memory_space<vmem>>, vector<128x128xf32>
    tpu.vector_store %arg7[%c0_9, %c0_10], %24 {strides = array<i32>} : memref<128x128xf32, #tpu.memory_space<vmem>>, vector<128x128xf32>,
    return
  }
  func.func @transform_0(%arg0: i32, %arg1: i32) -> i32 {
    %c0_i32 = arith.constant 0 : i32
    %c0_i32_0 = arith.constant 0 : i32
    return %c0_i32 : i32
  }
  func.func @transform_1(%arg0: i32, %arg1: i32) -> (i32, i32) {
    %c0_i32 = arith.constant 0 : i32
    %c0_i32_0 = arith.constant 0 : i32
    return %arg0, %c0_i32 : i32, i32
  }
  func.func @transform_2(%arg0: i32, %arg1: i32) -> (i32, i32) {
    %c0_i32 = arith.constant 0 : i32
    %c0_i32_0 = arith.constant 0 : i32
    return %arg1, %c0_i32 : i32, i32
  }
  func.func @transform_3(%arg0: i32, %arg1: i32) -> (i32, i32) {
    %c0_i32 = arith.constant 0 : i32
    %c0_i32_0 = arith.constant 0 : i32
    return %arg0, %c0_i32 : i32, i32
  }
  func.func @transform_4(%arg0: i32, %arg1: i32) -> (i32, i32) {
    %c0_i32 = arith.constant 0 : i32
    %c0_i32_0 = arith.constant 0 : i32
    return %c0_i32, %arg1 : i32, i32
  }
  func.func @transform_5(%arg0: i32, %arg1: i32) -> (i32, i32) {
    %c0_i32 = arith.constant 0 : i32
    return %arg0, %arg1 : i32, i32
  }
}

</mosaic_0001>

<bundles_post_ra>
// kernel: tpu_custom_call.1
= control target key start
LH: loop header
LB: loop body
LE: loop exit
PB: predicated region body
PF: predicated region fallthrough
CT: control target
= control target key end

     0   :  { %10 = vsyncpa [#allocation4], 0  ;;  %s1951_s0 = inlined_call_operand.vmem [shape: f32[5], index: 0, kind: input, shape index: {}]   ;;  %s1952_s1 = inlined_call_operand.vmem [shape: f32[256,32], index: 1, kind: input, shape index: {}]   ;;  %s1953_s2 = inlined_call_operand.vmem [shape: f32[256,32], index: 2, kind: input, shape index: {}]   ;;  %s1954_s3 = inlined_call_operand.vmem [shape: f32[256,1], index: 3, kind: input, shape index: {}]   ;;  %s1955_s4 = inlined_call_operand.vmem [shape: f32[1,256], index: 4, kind: input, shape index: {}]   ;;  %s1956_s5 = inlined_call_operand.hbm [shape: f32[256,256], index: 5, kind: output, shape index: {}]  }
   0x1   :  { %11 = vsyncpa [#allocation3], 0 }
   0x2   :  { %13 = vsyncpa [#allocation3 + $0x1], 0  ;;  %s1561_s18 = smov 0   ;;  %s1563_s19 = smov 0  }
   0x3   :  { %s1565_s20 = smov 0   ;;  %s1567_s21 = smov 0  }
   0x4   :  { %s1569_s22 = smov 0   ;;  %s1571_s23 = smov 0  }
   0x5   :  { %s1573_s24 = smov 0   ;;  %s1575_s25 = smov 0  }
   0x6 LB: > { %s1083_s26 = sadd.s32 4294967295, %s1523_s25   ;;  %s1084_s27 = sadd.s32 4294967294, %s1523_s25   ;;  %s1523_s25 = sphi %s1575_s25, %s19_s25   ;;  %s1519_s24 = sphi %s1573_s24, %s1970_s24   ;;  %s1515_s23 = sphi %s1571_s23, %s1969_s23   ;;  %s1511_s22 = sphi %s1569_s22, %s1968_s22   ;;  %s1507_s21 = sphi %s1567_s21, %s1967_s21   ;;  %s1503_s20 = sphi %s1565_s20, %s1966_s20   ;;  %s1499_s19 = sphi %s1563_s19, %s1965_s19   ;;  %s1495_s18 = sphi %s1561_s18, %s1964_s18  }
   0x7   : > { %s28_s28 = sadd.s32 1, %s1515_s23  ;;  %s31_s29 = sadd.s32 1, %s1519_s24 }
   0x8   : > { %p29_p0 = scmp.ge.s32.totalorder %s28_s28, 2  ;;  %s165_s30 = sadd.s32 1, %s1503_s20 }
   0x9   : > { %p175_p1 = scmp.ne.s32.totalorder %s1503_s20, %s1499_s19  ;;  %p176_p2 = scmp.eq.s32.totalorder %s1083_s26, 3 }
   0xa   : > { %s1972_s28 = smov (%p29_p0, %s28_s28), 0  ;;  %s1974_s29 = smov (!%p29_p0, %s31_s29), %s1519_s24 }
   0xb   : > { %s161_s6 = ssub.s32 %s1515_s23, %s1972_s28  ;;  %p1613_p3 = por %p176_p2, %p175_p1 }
   0xc   : > { %p33_p4 = scmp.ge.s32.totalorder %s1974_s29, 2  ;;  %p181_p5 = scmp.ne.s32.totalorder %s1499_s19, %s1495_s18 }
   0xd   : > { %p182_p6 = scmp.eq.s32.totalorder %s1084_s27, 3  ;;  %p1085_p7 = scmp.ge.s32.totalorder %s1523_s25, 1 }
   0xe   : > { %s1976_s29 = smov (%p33_p4, %s1974_s29), 0  ;;  %p189_p9 = scmp.lt.s32.totalorder %s1523_s25, 5 }
   0xf   : > { %p1622_p8 = por %p182_p6, %p181_p5  ;;  %s160_s9 = ssub.s32 %s1519_s24, %s1976_s29 }
  0x10   : > { %s162_s10 = sor.u32 %s161_s6, %s160_s9  ;;  %p1629_p10 = pnand %p1085_p7, %p189_p9 }
  0x11   : > { %s1958_s8 = scalar_select %p1622_p8, 1, 0 }
  0x12   : > { %p163_p11 = scmp.eq.s32.totalorder %s162_s10, 0  ;;  %p1633_p12 = scmp.eq.s32.totalorder %s1083_s26, 0 }
  0x13   : > { %p1296_p13 = pneg %p1629_p10  ;;  %s202_s15 = sshll.u32 %s1951_s0, 4  ;;  %s203_s15 = int_to_ptr.vmem [resolvable:$true] %s202_s15 }
  0x14   : > { %s1643_s16 = scalar_select %p163_p11, %s1503_s20, %s165_s30  }
  0x15   : > { %p1297_p0 = pnand %p1633_p12, %p1296_p13  ;;  %s1410_s17 = scalar_lea.vmem %s203_s15, 16 }
  0x16   : > { %p1411_p1 = scmp.ne.s32.totalorder %s203_s15, %s1410_s17  ;;  %p1418_p6 = scmp.lt.s32.totalorder %s203_s15, %s203_s15 }
  0x17   : > { %p1412_p2 = pneg %p1297_p0  ;;  %p1419_p7 = scmp.lt.s32.totalorder %s1410_s17, %s1410_s17 }
  0x19   : > { %p1413_p4 = pnand %p1412_p2, %p1411_p1  ;;  %p1420_p9 = por %p1419_p7, %p1418_p6 }
  0x1b   : > { %p1414_p5 = pneg %p1413_p4 }
  0x1d   : > { %p1421_p8 = pnand %p1420_p9, %p1414_p5 }
  0x1f   : > { %1424 = shalt.err (!%p1421_p8)
}
  0x20   : > { %s1525_s26 = smov [#allocation2]   ;;  %248 = sbr.rel (%p1629_p10) target bundleno = 417 (0x1a1), region = 40 }
  0x21   : > { %1299 = dma.vmem_to_smem (!%p1297_p0), %s203_s15, 16, %s1525_s26, [#allocation4]  }
  0x27   : > { %1486 = dma.done.wait (%p1633_p12), [#allocation4], 16  }
  0x28   : > { %1488 = vsyncadd (%p1633_p12), [#allocation4], 4294967280 }
  0x29   : > { %254 = sfence }
  0x2a   : > { %s1093_s27 = sshll.u32 %s1507_s21, 4  ;;  %s1091_s30 = sshll.u32 %s1511_s22, 4  ;;  %v1526_v0 = vmov 0   ;;  %vm344_vm0 = vcmask 261120  }
  0x2b   : > { %p297_p11 = scmp.lt.s32.totalorder %s1093_s27, 31  ;;  %p291_p13 = scmp.lt.s32.totalorder %s1091_s30, 31  ;;  %1377 = vset.pattern.permute.xlu1 %v1526_v0  ;;  %1376 = vset.pattern.permute.xlu0 %v1526_v0  ;;  %vm1662_vm1 = vmpackc.low %vm344_vm0, %vm344_vm0 }
  0x2c   : > { %p308_p8 = scmp.lt.s32.totalorder %s1507_s21, 1 }
  0x2d   : > { %s1978_s27 = smov (!%p297_p11, %s1093_s27), 31  ;;  %s1980_s30 = smov (!%p291_p13, %s1091_s30), 31 }
  0x2e   : > { %s1094_s6 = sshll.u32 %s1978_s27, 3  ;;  %s1092_s12 = sshll.u32 %s1980_s30, 3 }
  0x2f   : > { %s1658_s11 = scalar_lea.vmem %s1953_s2, %s1094_s6  ;;  %s1673_s15 = scalar_lea.vmem %s1952_s1, %s1092_s12 }
  0x30   : > { %v328_v2 = vld [vmem:[%s1658_s11] sm:$0xff]  ;;  %v329_v3 = vld [vmem:[%s1658_s11 + $0x8] sm:$0xff]  ;;  %v330_v4 = vld [vmem:[%s1658_s11 + $0x10] sm:$0xff]  ;;  %s1696_s27 = scalar_lea.vmem %s1954_s3, %s1092_s12  ;;  %s287_s12 = sand.u32 1, %s1499_s19  }
  0x31   : > { %v1226_v5 = vpack.c.bf16 %v329_v3, %v328_v2  ;;  %v331_v6 = vld [vmem:[%s1658_s11 + $0x18] sm:$0xff]  ;;  %v312_v8 = vld [vmem:[%s1673_s15] sm:$0xff]  ;;  %v333_v11 = vld [vmem:[%s1658_s11 + $0x28] sm:$0xff]  ;;  %s309_s30 = scalar_select %p308_p8, %s1507_s21, 1 }
  0x32   : > { %v1232_v7 = vpack.c.bf16 %v331_v6, %v330_v4  ;;  %v320_v9 = vld [vmem:[%s1673_s15 + $0x40] sm:$0xff]  ;;  %1202 = vmatprep.mubr.msk.f32.mxu0 %vm344_vm0, %v312_v8  ;;  %v588_v13 = vld [vmem:[%s1696_s27 + $0x10] sm:$0xff]  ;;  %v589_v15 = vld [vmem:[%s1696_s27 + $0x18] sm:$0xff]  ;;  %s1090_s13 = sshll.u32 %s287_s12, 7  ;;  %s1899_s6 = scalar_lea.sflag [#allocation3], %s287_s12 }
  0x33   : > { %1228 = vmatprep.subr.msk.bf16.mxu0 %vm1662_vm1, %v1226_v5  ;;  %1274 = vmatprep.subr.msk.bf16.mxu1 %vm1662_vm1, %v1226_v5  ;;  %v332_v10 = vld [vmem:[%s1658_s11 + $0x20] sm:$0xff]  ;;  %v334_v16 = vld [vmem:[%s1658_s11 + $0x30] sm:$0xff]  ;;  %v335_v17 = vld [vmem:[%s1658_s11 + $0x38] sm:$0xff]  ;;  %s310_s10 = scalar_lea.vmem %s1955_s4, %s309_s30  ;;  %s1861_s14 = scalar_lea.vmem [#allocation5], %s1090_s13 }
  0x34   : > { %1231 = vmatpush3.bf16.xpose.msk.msra.mxu0 %vm1662_vm1, %v1226_v5  ;;  %1282 = vmatpush3.bf16.xpose.msk.msra.mxu1 %vm1662_vm1, %v1226_v5  ;;  %v1238_v12 = vpack.c.bf16 %v333_v11, %v332_v10  ;;  %v586_v14 = vld [vmem:[%s1696_s27] sm:$0xff]  ;;  %v587_v18 = vld [vmem:[%s1696_s27 + $0x8] sm:$0xff]  ;;  %v1244_v20 = vpack.c.bf16 %v335_v17, %v334_v16  ;;  %v593_v22 = vld [vmem:[%s1696_s27 + $0x38] sm:$0xff]  ;;  %s963_s26 = sshll.u32 %s1861_s14, 4  ;;  %s1894_s26 = int_to_ptr.vmem [resolvable:$true] %s963_s26 }
  0x35   : > { %1234 = vmatprep.subr.msk.bf16.mxu0 %vm1662_vm1, %v1232_v7  ;;  %1275 = vmatprep.subr.msk.bf16.mxu1 %vm1662_vm1, %v1232_v7  ;;  %v591_v19 = vld [vmem:[%s1696_s27 + $0x28] sm:$0xff]  ;;  %v590_v21 = vld [vmem:[%s1696_s27 + $0x20] sm:$0xff]  ;;  %v592_v25 = vld [vmem:[%s1696_s27 + $0x30] sm:$0xff]  ;;  %s1425_s9 = scalar_lea.vmem %s1894_s26, 2048 }
  0x36   : > { %1214 = vmatprep.mubr.msk.f32.mxu1 %vm344_vm0, %v320_v9  ;;  %615 = vperm.xlu1 %1377, %v588_v13   ;;  %v336_v23 = vld [vmem:[%s1658_s11 + $0x40] sm:$0xff]  ;;  %v337_v24 = vld [vmem:[%s1658_s11 + $0x48] sm:$0xff]  ;;  %v597_v29 = vld [vmem:[%s1696_s27 + $0x58] sm:$0xff]  ;;  %p1426_p10 = scmp.ne.s32.totalorder %s1894_s26, %s1425_s9 }
  0x37   : > { %605 = vperm.xlu0 %1376, %v586_v14   ;;  %v595_v26 = vld [vmem:[%s1696_s27 + $0x48] sm:$0xff]  ;;  %v1250_v27 = vpack.c.bf16 %v337_v24, %v336_v23  ;;  %v594_v28 = vld [vmem:[%s1696_s27 + $0x40] sm:$0xff]  ;;  %v338_v30 = vld [vmem:[%s1658_s11 + $0x50] sm:$0xff] }
  0x38   : > { %v339_v31 = vld [vmem:[%s1658_s11 + $0x58] sm:$0xff]  ;;  %v596_v32 = vld [vmem:[%s1696_s27 + $0x50] sm:$0xff]  ;;  %v599_v33 = vld [vmem:[%s1696_s27 + $0x68] sm:$0xff]  ;;  %p1427_p12 = pnand %p1426_p10, %p1613_p3 }
  0x39   : > { %v1256_v34 = vpack.c.bf16 %v339_v31, %v338_v30  ;;  %v598_v35 = vld [vmem:[%s1696_s27 + $0x60] sm:$0xff]  ;;  %v601_v36 = vld [vmem:[%s1696_s27 + $0x78] sm:$0xff]  ;;  %v341_v38 = vld [vmem:[%s1658_s11 + $0x68] sm:$0xff] }
  0x3a   : > { %620 = vperm.xlu1 %1377, %v589_v15   ;;  %v340_v37 = vld [vmem:[%s1658_s11 + $0x60] sm:$0xff]  ;;  %v600_v39 = vld [vmem:[%s1696_s27 + $0x70] sm:$0xff]  ;;  %v343_v42 = vld [vmem:[%s1658_s11 + $0x78] sm:$0xff]  ;;  %p1428_p0 = pneg %p1427_p12 }
  0x3b   : > { %610 = vperm.xlu0 %1376, %v587_v18   ;;  %v1262_v40 = vpack.c.bf16 %v341_v38, %v340_v37  ;;  %v342_v41 = vld [vmem:[%s1658_s11 + $0x70] sm:$0xff]  ;;  %v313_v44 = vld [vmem:[%s1673_s15 + $0x8] sm:$0xff]  ;;  %v315_v48 = vld [vmem:[%s1673_s15 + $0x18] sm:$0xff]  ;;  %s1130_s11 = sld [smem:[#allocation2 + $0x4]] }
  0x3c   : > { %1237 = vmatpush3.bf16.xpose.msk.msra.mxu0 %vm1662_vm1, %v1232_v7  ;;  %1283 = vmatpush3.bf16.xpose.msk.msra.mxu1 %vm1662_vm1, %v1232_v7  ;;  %v1268_v43 = vpack.c.bf16 %v343_v42, %v342_v41  ;;  %v321_v45 = vld [vmem:[%s1673_s15 + $0x48] sm:$0xff]  ;;  %v314_v46 = vld [vmem:[%s1673_s15 + $0x10] sm:$0xff]  ;;  %v323_v49 = vld [vmem:[%s1673_s15 + $0x58] sm:$0xff] }
  0x3d   : > { %1240 = vmatprep.subr.msk.bf16.mxu0 %vm1662_vm1, %v1238_v12  ;;  %1276 = vmatprep.subr.msk.bf16.mxu1 %vm1662_vm1, %v1238_v12  ;;  %v322_v47 = vld [vmem:[%s1673_s15 + $0x50] sm:$0xff]  ;;  %v316_v50 = vld [vmem:[%s1673_s15 + $0x20] sm:$0xff]  ;;  %v317_v52 = vld [vmem:[%s1673_s15 + $0x28] sm:$0xff] }
  0x3e   : > { %630 = vperm.xlu1 %1377, %v591_v19   ;;  %v324_v51 = vld [vmem:[%s1673_s15 + $0x60] sm:$0xff]  ;;  %v325_v53 = vld [vmem:[%s1673_s15 + $0x68] sm:$0xff]  ;;  %v318_v54 = vld [vmem:[%s1673_s15 + $0x30] sm:$0xff] }
  0x3f   : > { %625 = vperm.xlu0 %1376, %v590_v21   ;;  %v326_v55 = vld [vmem:[%s1673_s15 + $0x70] sm:$0xff]  ;;  %v319_v56 = vld [vmem:[%s1673_s15 + $0x38] sm:$0xff]  ;;  %v1129_v8 = vld [vmem:[%s310_s10] ss:$0 sm:$0xff]  ;;  %s1527_s10 = smov [#allocation5]  }
  0x40   : > { %v327_v57 = vld [vmem:[%s1673_s15 + $0x78] sm:$0xff]  ;;  %s1137_s15 = sshll.u32 %s1511_s22, 5 }
  0x41   : > { %v1817_v24 = vstv %s1130_s11  ;;  %s960_s17 = sadd.s32 %s1507_s21, %s1137_s15  ;;  %s1429_s11 = sshll.u32 %s1527_s10, 4  ;;  %s1430_s11 = int_to_ptr.vmem [resolvable:$false] %s1429_s11 }
  0x42   : > { %640 = vperm.xlu1 %1377, %v593_v22   ;;  %s1134_s22 = sshll.u32 %s960_s17, 7  ;;  %s1431_s13 = scalar_lea.vmem %s1430_s11, 4096 }
  0x43   : > { %635 = vperm.xlu0 %1376, %v592_v25   ;;  %s1892_s21 = scalar_lea.hbm %s1956_s5, %s1134_s22  ;;  %p1432_p1 = scmp.lt.s32.totalorder %s1894_s26, %s1430_s11 }
  0x44   : > { %1243 = vmatpush3.bf16.xpose.msk.msra.mxu0 %vm1662_vm1, %v1238_v12  ;;  %1284 = vmatpush3.bf16.xpose.msk.msra.mxu1 %vm1662_vm1, %v1238_v12  ;;  %p1433_p2 = scmp.lt.s32.totalorder %s1431_s13, %s1425_s9 }
  0x45   : > { %1246 = vmatprep.subr.msk.bf16.mxu0 %vm1662_vm1, %v1244_v20  ;;  %1277 = vmatprep.subr.msk.bf16.mxu1 %vm1662_vm1, %v1244_v20 }
  0x46   : > { %650 = vperm.xlu1 %1377, %v595_v26   ;;  %p1434_p4 = por %p1433_p2, %p1432_p1 }
  0x47   : > { %645 = vperm.xlu0 %1376, %v594_v28  }
  0x48   : > { %p1435_p5 = pnand %p1434_p4, %p1428_p0 }
  0x4a   : > { %660 = vperm.xlu1 %1377, %v597_v29  }
  0x4b   : > { %655 = vperm.xlu0 %1376, %v596_v32  }
  0x4c   : > { %1249 = vmatpush3.bf16.xpose.msk.msra.mxu0 %vm1662_vm1, %v1244_v20  ;;  %1285 = vmatpush3.bf16.xpose.msk.msra.mxu1 %vm1662_vm1, %v1244_v20 }
  0x4d   : > { %1252 = vmatprep.subr.msk.bf16.mxu0 %vm1662_vm1, %v1250_v27  ;;  %1278 = vmatprep.subr.msk.bf16.mxu1 %vm1662_vm1, %v1250_v27 }
  0x4e   : > { %670 = vperm.xlu1 %1377, %v599_v33  }
  0x4f   : > { %665 = vperm.xlu0 %1376, %v598_v35  }
  0x52   : > { %680 = vperm.xlu1 %1377, %v601_v36  }
  0x53   : > { %675 = vperm.xlu0 %1376, %v600_v39  }
  0x54   : > { %1255 = vmatpush3.bf16.xpose.msk.msra.mxu0 %vm1662_vm1, %v1250_v27  ;;  %1286 = vmatpush3.bf16.xpose.msk.msra.mxu1 %vm1662_vm1, %v1250_v27 }
  0x55   : > { %1258 = vmatprep.subr.msk.bf16.mxu0 %vm1662_vm1, %v1256_v34  ;;  %1279 = vmatprep.subr.msk.bf16.mxu1 %vm1662_vm1, %v1256_v34 }
  0x5c   : > { %1261 = vmatpush3.bf16.xpose.msk.msra.mxu0 %vm1662_vm1, %v1256_v34  ;;  %1287 = vmatpush3.bf16.xpose.msk.msra.mxu1 %vm1662_vm1, %v1256_v34 }
  0x5d   : > { %1264 = vmatprep.subr.msk.bf16.mxu0 %vm1662_vm1, %v1262_v40  ;;  %1280 = vmatprep.subr.msk.bf16.mxu1 %vm1662_vm1, %v1262_v40 }
  0x64   : > { %1267 = vmatpush3.bf16.xpose.msk.msra.mxu0 %vm1662_vm1, %v1262_v40  ;;  %1288 = vmatpush3.bf16.xpose.msk.msra.mxu1 %vm1662_vm1, %v1262_v40 }
  0x65   : > { %1270 = vmatprep.subr.msk.bf16.mxu0 %vm1662_vm1, %v1268_v43  ;;  %1281 = vmatprep.subr.msk.bf16.mxu1 %vm1662_vm1, %v1268_v43 }
  0x6c   : > { %1273 = vmatpush3.bf16.xpose.msk.msra.mxu0 %vm1662_vm1, %v1268_v43  ;;  %1289 = vmatpush3.bf16.xpose.msk.msra.mxu1 %vm1662_vm1, %v1268_v43 }
  0x73   : > { %1203 = vmatmul.mubr.msk.f32.vlgmr.msra.gmra.mrb[0].mxu0 %vm344_vm0, %v313_v44  ;;  %1215 = vmatmul.mubr.msk.f32.vlgmr.msra.gmra.mrb[0].mxu1 %vm344_vm0, %v321_v45 }
  0x74   : > { %1205 = vmatprep.mubr.msk.f32.mxu0 %vm344_vm0, %v314_v46  ;;  %1217 = vmatprep.mubr.msk.f32.mxu1 %vm344_vm0, %v322_v47 }
  0x77   : > { %1206 = vmatmul.mubr.msk.f32.gmra.mrb[2].mxu0 %vm344_vm0, %v315_v48  ;;  %1218 = vmatmul.mubr.msk.f32.gmra.mrb[2].mxu1 %vm344_vm0, %v323_v49 }
  0x78   : > { %1208 = vmatprep.mubr.msk.f32.mxu0 %vm344_vm0, %v316_v50  ;;  %1220 = vmatprep.mubr.msk.f32.mxu1 %vm344_vm0, %v324_v51 }
  0x7b   : > { %1209 = vmatmul.mubr.msk.f32.gmra.mrb[4].mxu0 %vm344_vm0, %v317_v52  ;;  %1221 = vmatmul.mubr.msk.f32.gmra.mrb[4].mxu1 %vm344_vm0, %v325_v53 }
  0x7c   : > { %1211 = vmatprep.mubr.msk.f32.mxu0 %vm344_vm0, %v318_v54  ;;  %1223 = vmatprep.mubr.msk.f32.mxu1 %vm344_vm0, %v326_v55 }
  0x7f   : > { %1212 = vmatmul.mubr.msk.f32.gmra.mrb[6].mxu0 %vm344_vm0, %v319_v56  ;;  %1224 = vmatmul.mubr.msk.f32.gmra.mrb[6].mxu1 %vm344_vm0, %v327_v57 }
  0xb5   : > { %v616_v58 = vpop.permute.xlu1 %615 }
  0xb6   : > { %v606_v59 = vpop.permute.xlu0 %605  ;;  %v691_v9 = vadd.f32 %v1129_v8, %v616_v58 }
  0xb7   : > { %v689_v10 = vadd.f32 %v1129_v8, %v606_v59 }
  0xb9   : > { %v621_v60 = vpop.permute.xlu1 %620 }
  0xba   : > { %v611_v61 = vpop.permute.xlu0 %610  ;;  %v692_v11 = vadd.f32 %v1129_v8, %v621_v60 }
  0xbb   : > { %v690_v12 = vadd.f32 %v1129_v8, %v611_v61 }
  0xbd   : > { %v631_v62 = vpop.permute.xlu1 %630 }
  0xbe   : > { %v626_v63 = vpop.permute.xlu0 %625  ;;  %v1809_v13 = vadd.f32 %v1129_v8, %v631_v62 }
  0xbf   : > { %v1811_v16 = vadd.f32 %v1129_v8, %v626_v63 }
  0xc1   : > { %v641_v0 = vpop.permute.xlu1 %640 }
  0xc2   : > { %v636_v1 = vpop.permute.xlu0 %635  ;;  %v1813_v17 = vadd.f32 %v1129_v8, %v641_v0 }
  0xc3   : > { %v1815_v18 = vadd.f32 %v1129_v8, %v636_v1 }
  0xc5   : > { %v651_v2 = vpop.permute.xlu1 %650 }
  0xc6   : > { %v646_v3 = vpop.permute.xlu0 %645  ;;  %v698_v19 = vadd.f32 %v1129_v8, %v651_v2 }
  0xc7   : > { %v697_v22 = vadd.f32 %v1129_v8, %v646_v3 }
  0xc9   : > { %v661_v4 = vpop.permute.xlu1 %660 }
  0xca   : > { %v656_v5 = vpop.permute.xlu0 %655  ;;  %v700_v28 = vadd.f32 %v1129_v8, %v661_v4 }
  0xcb   : > { %v699_v29 = vadd.f32 %v1129_v8, %v656_v5 }
  0xcd   : > { %v671_v6 = vpop.permute.xlu1 %670 }
  0xce   : > { %v666_v7 = vpop.permute.xlu0 %665  ;;  %v1819_v32 = vadd.f32 %v1129_v8, %v671_v6 }
  0xcf   : > { %v1821_v33 = vadd.f32 %v1129_v8, %v666_v7 }
  0xd1   : > { %v681_v14 = vpop.permute.xlu1 %680 }
  0xd2   : > { %v676_v15 = vpop.permute.xlu0 %675  ;;  %v1823_v36 = vadd.f32 %v1129_v8, %v681_v14 }
  0xd3   : > { %v1825_v37 = vadd.f32 %v1129_v8, %v676_v15 }
 0x146   : > { %v1204_v20 = vpop.f32.mrb[0].mxu0  ;;  %v1216_v21 = vpop.f32.mrb[0].mxu1 }
 0x147   : > { %v706_v23 = vmul.f32 2.0, %v1204_v20  ;;  %v714_v25 = vmul.f32 2.0, %v1216_v21  ;;  %v507_v26 = vpop.f32.mrb[1].mxu0  ;;  %v547_v27 = vpop.f32.mrb[1].mxu1 }
 0x148   : > { %v705_v30 = vmul.f32 2.0, %v507_v26  ;;  %v713_v31 = vmul.f32 2.0, %v547_v27 }
 0x149   : > { %v722_v34 = vsub.f32 %v690_v12, %v706_v23  ;;  %v730_v35 = vsub.f32 %v698_v19, %v714_v25 }
 0x14a   : > { %v721_v38 = vsub.f32 %v689_v10, %v705_v30  ;;  %v729_v39 = vsub.f32 %v697_v22, %v713_v31  ;;  %v1207_v40 = vpop.f32.mrb[2].mxu0  ;;  %v1219_v41 = vpop.f32.mrb[2].mxu1 }
 0x14b   : > { %v738_v42 = vmax.f32 %v722_v34, 0.0  ;;  %v746_v43 = vmax.f32 %v730_v35, 0.0  ;;  %v708_v44 = vmul.f32 2.0, %v1207_v40  ;;  %v716_v45 = vmul.f32 2.0, %v1219_v41  ;;  %v517_v46 = vpop.f32.mrb[3].mxu0  ;;  %v557_v47 = vpop.f32.mrb[3].mxu1 }
 0x14c   : > { %v737_v48 = vmax.f32 %v721_v38, 0.0  ;;  %v745_v49 = vmax.f32 %v729_v39, 0.0  ;;  %v707_v50 = vmul.f32 2.0, %v517_v46  ;;  %v715_v51 = vmul.f32 2.0, %v557_v47 }
 0x14d   : > { %v756_v52 = vmul.f32 %v1817_v24, %v738_v42  ;;  %v764_v53 = vmul.f32 %v1817_v24, %v746_v43  ;;  %v724_v54 = vsub.f32 %v692_v11, %v708_v44  ;;  %v732_v55 = vsub.f32 %v700_v28, %v716_v45 }
 0x14e   : > { %v755_v56 = vmul.f32 %v1817_v24, %v737_v48  ;;  %v763_v57 = vmul.f32 %v1817_v24, %v745_v49  ;;  %v723_v58 = vsub.f32 %v691_v9, %v707_v50  ;;  %v731_v59 = vsub.f32 %v699_v29, %v715_v51  ;;  %v1210_v60 = vpop.f32.mrb[4].mxu0  ;;  %v1222_v61 = vpop.f32.mrb[4].mxu1 }
 0x14f   : > { %v773_v62 = vmul.f32 1.442695, %v756_v52  ;;  %v789_v63 = vmul.f32 1.442695, %v764_v53  ;;  %v740_v0 = vmax.f32 %v724_v54, 0.0  ;;  %v748_v1 = vmax.f32 %v732_v55, 0.0 }
 0x150   : > { %v771_v2 = vmul.f32 1.442695, %v755_v56  ;;  %v787_v3 = vmul.f32 1.442695, %v763_v57  ;;  %v739_v4 = vmax.f32 %v723_v58, 0.0  ;;  %v747_v5 = vmax.f32 %v731_v59, 0.0 }
 0x151   : > { %1378 = vpow2.f32 %v773_v62  ;;  %v758_v6 = vmul.f32 %v1817_v24, %v740_v0  ;;  %v766_v7 = vmul.f32 %v1817_v24, %v748_v1  ;;  %v710_v8 = vmul.f32 2.0, %v1210_v60  ;;  %v527_v10 = vpop.f32.mrb[5].mxu0  ;;  %v567_v11 = vpop.f32.mrb[5].mxu1 }
 0x152   : > { %1380 = vpow2.f32 %v789_v63  ;;  %v757_v9 = vmul.f32 %v1817_v24, %v739_v4  ;;  %v765_v12 = vmul.f32 %v1817_v24, %v747_v5  ;;  %v718_v14 = vmul.f32 2.0, %v1222_v61  ;;  %v1213_v15 = vpop.f32.mrb[6].mxu0  ;;  %v1225_v19 = vpop.f32.mrb[6].mxu1 }
 0x153   : > { %1382 = vpow2.f32 %v771_v2  ;;  %v777_v20 = vmul.f32 1.442695, %v758_v6  ;;  %v793_v21 = vmul.f32 1.442695, %v766_v7  ;;  %v726_v22 = vsub.f32 %v1809_v13, %v710_v8  ;;  %v537_v23 = vpop.f32.mrb[7].mxu0  ;;  %v577_v25 = vpop.f32.mrb[7].mxu1 }
 0x154   : > { %1384 = vpow2.f32 %v787_v3  ;;  %v775_v26 = vmul.f32 1.442695, %v757_v9  ;;  %v791_v27 = vmul.f32 1.442695, %v765_v12  ;;  %v734_v28 = vsub.f32 %v1819_v32, %v718_v14 }
 0x155   : > { %1386 = vpow2.f32 %v777_v20  ;;  %v742_v29 = vmax.f32 %v726_v22, 0.0  ;;  %v709_v30 = vmul.f32 2.0, %v527_v10  ;;  %v717_v31 = vmul.f32 2.0, %v567_v11 }
 0x156   : > { %1388 = vpow2.f32 %v793_v21  ;;  %v750_v34 = vmax.f32 %v734_v28, 0.0  ;;  %v712_v35 = vmul.f32 2.0, %v1213_v15  ;;  %v720_v38 = vmul.f32 2.0, %v1225_v19 }
 0x157   : > { %1390 = vpow2.f32 %v775_v26  ;;  %v760_v39 = vmul.f32 %v1817_v24, %v742_v29  ;;  %v725_v13 = vsub.f32 %v1811_v16, %v709_v30  ;;  %v733_v40 = vsub.f32 %v1821_v33, %v717_v31 }
 0x158   : > { %1392 = vpow2.f32 %v791_v27  ;;  %v768_v41 = vmul.f32 %v1817_v24, %v750_v34  ;;  %v728_v32 = vsub.f32 %v1813_v17, %v712_v35  ;;  %v736_v42 = vsub.f32 %v1823_v36, %v720_v38 }
 0x159   : > { %v781_v43 = vmul.f32 1.442695, %v760_v39  ;;  %v741_v44 = vmax.f32 %v725_v13, 0.0  ;;  %v749_v45 = vmax.f32 %v733_v40, 0.0  ;;  %v711_v46 = vmul.f32 2.0, %v537_v23 }
 0x15a   : > { %v797_v47 = vmul.f32 1.442695, %v768_v41  ;;  %v744_v48 = vmax.f32 %v728_v32, 0.0  ;;  %v752_v49 = vmax.f32 %v736_v42, 0.0  ;;  %v1843_v50 = vmul.f32 2.0, %v577_v25 }
 0x15b   : > { %v1379_v16 = vpop.eup %1378  ;;  %1394 = vpow2.f32 %v781_v43  ;;  %v759_v33 = vmul.f32 %v1817_v24, %v741_v44  ;;  %v767_v51 = vmul.f32 %v1817_v24, %v749_v45  ;;  %v727_v17 = vsub.f32 %v1815_v18, %v711_v46 }
 0x15c   : > { %v1381_v52 = vpop.eup %1380  ;;  %v804_v36 = vmul.f32 %v1379_v16, %v1379_v16  ;;  %1396 = vpow2.f32 %v797_v47  ;;  %v762_v53 = vmul.f32 %v1817_v24, %v744_v48  ;;  %v1850_v54 = vmul.f32 %v1817_v24, %v752_v49 }
 0x15d   : > { %v1383_v55 = vpop.eup %1382  ;;  %v812_v56 = vmul.f32 %v1381_v52, %v1381_v52  ;;  %v779_v57 = vmul.f32 1.442695, %v759_v33  ;;  %v1853_v58 = vmul.f32 1.442695, %v767_v51  ;;  %v1855_v59 = vmax.f32 %v727_v17, 0.0 }
 0x15e   : > { %v1385_v60 = vpop.eup %1384  ;;  %v820_v61 = vadd.f32 %v1379_v16, %v804_v36  ;;  %v836_v18 = vmul.f32 %v804_v36, %v804_v36  ;;  %v803_v62 = vmul.f32 %v1383_v55, %v1383_v55  ;;  %v1857_v63 = vmul.f32 1.442695, %v762_v53 }
 0x15f   : > { %v1387_v0 = vpop.eup %1386  ;;  %v828_v1 = vadd.f32 %v1381_v52, %v812_v56  ;;  %v844_v2 = vmul.f32 %v812_v56, %v812_v56  ;;  %v811_v3 = vmul.f32 %v1385_v60, %v1385_v60  ;;  %1398 = vpow2.f32 %v779_v57 }
 0x160   : > { %v1389_v4 = vpop.eup %1388  ;;  %v852_v5 = vadd.f32 %v836_v18, %v820_v61  ;;  %v868_v6 = vmul.f32 %v836_v18, %v836_v18  ;;  %v819_v7 = vadd.f32 %v1383_v55, %v803_v62  ;;  %v835_v8 = vmul.f32 %v803_v62, %v803_v62 }
 0x161   : > { %v1391_v10 = vpop.eup %1390  ;;  %v860_v11 = vadd.f32 %v844_v2, %v828_v1  ;;  %v876_v9 = vmul.f32 %v844_v2, %v844_v2  ;;  %v827_v12 = vadd.f32 %v1385_v60, %v811_v3  ;;  %v843_v14 = vmul.f32 %v811_v3, %v811_v3 }
 0x162   : > { %v1393_v15 = vpop.eup %1392  ;;  %v884_v19 = vadd.f32 %v868_v6, %v852_v5  ;;  %v900_v20 = vmul.f32 %v868_v6, %v868_v6  ;;  %v851_v21 = vadd.f32 %v835_v8, %v819_v7  ;;  %v867_v22 = vmul.f32 %v835_v8, %v835_v8 }
 0x163   : > { %v892_v23 = vadd.f32 %v876_v9, %v860_v11  ;;  %v908_v25 = vmul.f32 %v876_v9, %v876_v9  ;;  %v859_v26 = vadd.f32 %v843_v14, %v827_v12  ;;  %v875_v27 = vmul.f32 %v843_v14, %v843_v14 }
 0x164   : > { %v916_v28 = vadd.f32 %v900_v20, %v884_v19  ;;  %v883_v29 = vadd.f32 %v867_v22, %v851_v21  ;;  %v899_v30 = vmul.f32 %v867_v22, %v867_v22  ;;  %v806_v31 = vmul.f32 %v1387_v0, %v1387_v0 }
 0x165   : > { %v1395_v34 = vpop.eup %1394  ;;  %v924_v35 = vadd.f32 %v908_v25, %v892_v23  ;;  %v891_v38 = vadd.f32 %v875_v27, %v859_v26  ;;  %v907_v39 = vmul.f32 %v875_v27, %v875_v27  ;;  %v814_v13 = vmul.f32 %v1389_v4, %v1389_v4 }
 0x166   : > { %v1397_v40 = vpop.eup %1396  ;;  %932 = vst [vmem:[%s1861_s14 + $0x8] sm:$0xff] %v916_v28  ;;  %v915_v41 = vadd.f32 %v899_v30, %v883_v29  ;;  %v822_v32 = vadd.f32 %v1387_v0, %v806_v31  ;;  %v838_v42 = vmul.f32 %v806_v31, %v806_v31  ;;  %v805_v43 = vmul.f32 %v1391_v10, %v1391_v10 }
 0x167   : > { %940 = vst [vmem:[%s1861_s14 + $0x48] sm:$0xff] %v924_v35  ;;  %v923_v44 = vadd.f32 %v907_v39, %v891_v38  ;;  %v830_v45 = vadd.f32 %v1389_v4, %v814_v13  ;;  %v846_v46 = vmul.f32 %v814_v13, %v814_v13  ;;  %v813_v47 = vmul.f32 %v1393_v15, %v1393_v15 }
 0x168   : > { %931 = vst [vmem:[%s1861_s14] sm:$0xff] %v915_v41  ;;  %v854_v48 = vadd.f32 %v838_v42, %v822_v32  ;;  %v870_v49 = vmul.f32 %v838_v42, %v838_v42  ;;  %v821_v16 = vadd.f32 %v1391_v10, %v805_v43  ;;  %v837_v33 = vmul.f32 %v805_v43, %v805_v43 }
 0x169   : > { %v1399_v51 = vpop.eup %1398  ;;  %939 = vst [vmem:[%s1861_s14 + $0x40] sm:$0xff] %v923_v44  ;;  %v862_v17 = vadd.f32 %v846_v46, %v830_v45  ;;  %v878_v52 = vmul.f32 %v846_v46, %v846_v46  ;;  %v829_v36 = vadd.f32 %v1393_v15, %v813_v47  ;;  %v845_v53 = vmul.f32 %v813_v47, %v813_v47 }
 0x16a   : > { %v886_v55 = vadd.f32 %v870_v49, %v854_v48  ;;  %v902_v56 = vmul.f32 %v870_v49, %v870_v49  ;;  %v853_v57 = vadd.f32 %v837_v33, %v821_v16  ;;  %v869_v60 = vmul.f32 %v837_v33, %v837_v33 }
 0x16b   : > { %v894_v61 = vadd.f32 %v878_v52, %v862_v17  ;;  %v910_v18 = vmul.f32 %v878_v52, %v878_v52  ;;  %v861_v62 = vadd.f32 %v845_v53, %v829_v36  ;;  %v877_v0 = vmul.f32 %v845_v53, %v845_v53 }
 0x16c   : > { %v918_v1 = vadd.f32 %v902_v56, %v886_v55  ;;  %v885_v2 = vadd.f32 %v869_v60, %v853_v57  ;;  %v901_v3 = vmul.f32 %v869_v60, %v869_v60  ;;  %v808_v4 = vmul.f32 %v1395_v34, %v1395_v34 }
 0x16d   : > { %v926_v5 = vadd.f32 %v910_v18, %v894_v61  ;;  %v893_v6 = vadd.f32 %v877_v0, %v861_v62  ;;  %v909_v7 = vmul.f32 %v877_v0, %v877_v0  ;;  %v816_v8 = vmul.f32 %v1397_v40, %v1397_v40 }
 0x16e   : > { %934 = vst [vmem:[%s1861_s14 + $0x18] sm:$0xff] %v918_v1  ;;  %v917_v10 = vadd.f32 %v901_v3, %v885_v2  ;;  %v824_v11 = vadd.f32 %v1395_v34, %v808_v4  ;;  %v840_v9 = vmul.f32 %v808_v4, %v808_v4  ;;  %v807_v12 = vmul.f32 %v1399_v51, %v1399_v51 }
 0x16f   : > { %942 = vst [vmem:[%s1861_s14 + $0x58] sm:$0xff] %v926_v5  ;;  %v925_v14 = vadd.f32 %v909_v7, %v893_v6  ;;  %v832_v15 = vadd.f32 %v1397_v40, %v816_v8  ;;  %v848_v19 = vmul.f32 %v816_v8, %v816_v8  ;;  %1400 = vpow2.f32 %v1853_v58 }
 0x170   : > { %933 = vst [vmem:[%s1861_s14 + $0x10] sm:$0xff] %v917_v10  ;;  %v856_v20 = vadd.f32 %v840_v9, %v824_v11  ;;  %v872_v21 = vmul.f32 %v840_v9, %v840_v9  ;;  %v823_v22 = vadd.f32 %v1399_v51, %v807_v12  ;;  %v839_v23 = vmul.f32 %v807_v12, %v807_v12 }
 0x171   : > { %941 = vst [vmem:[%s1861_s14 + $0x50] sm:$0xff] %v925_v14  ;;  %v864_v25 = vadd.f32 %v848_v19, %v832_v15  ;;  %v880_v26 = vmul.f32 %v848_v19, %v848_v19  ;;  %1402 = vpow2.f32 %v1857_v63  ;;  %v801_v27 = vmul.f32 1.442695, %v1850_v54 }
 0x172   : > { %v888_v28 = vadd.f32 %v872_v21, %v856_v20  ;;  %v904_v29 = vmul.f32 %v872_v21, %v872_v21  ;;  %v855_v30 = vadd.f32 %v839_v23, %v823_v22  ;;  %v871_v31 = vmul.f32 %v839_v23, %v839_v23 }
 0x173   : > { %v896_v58 = vadd.f32 %v880_v26, %v864_v25  ;;  %v912_v34 = vmul.f32 %v880_v26, %v880_v26  ;;  %1404 = vpow2.f32 %v801_v27  ;;  %v761_v35 = vmul.f32 %v1817_v24, %v1855_v59 }
 0x174   : > { %v920_v38 = vadd.f32 %v904_v29, %v888_v28  ;;  %v887_v39 = vadd.f32 %v871_v31, %v855_v30  ;;  %v903_v13 = vmul.f32 %v871_v31, %v871_v31  ;;  %v735_v63 = vsub.f32 %v1825_v37, %v1843_v50 }
 0x175   : > { %v928_v40 = vadd.f32 %v912_v34, %v896_v58  ;;  %v783_v54 = vmul.f32 1.442695, %v761_v35 }
 0x176   : > { %936 = vst [vmem:[%s1861_s14 + $0x28] sm:$0xff] %v920_v38  ;;  %v919_v41 = vadd.f32 %v903_v13, %v887_v39  ;;  %v751_v32 = vmax.f32 %v735_v63, 0.0 }
 0x177   : > { %944 = vst [vmem:[%s1861_s14 + $0x68] sm:$0xff] %v928_v40  ;;  %1406 = vpow2.f32 %v783_v54 }
 0x178   : > { %935 = vst [vmem:[%s1861_s14 + $0x20] sm:$0xff] %v919_v41  ;;  %v769_v42 = vmul.f32 %v1817_v24, %v751_v32 }
 0x179   : > { %v1401_v43 = vpop.eup %1400 }
 0x17a   : > { %v815_v44 = vmul.f32 %v1401_v43, %v1401_v43  ;;  %v799_v45 = vmul.f32 1.442695, %v769_v42 }
 0x17b   : > { %v1403_v59 = vpop.eup %1402 }
 0x17c   : > { %v831_v46 = vadd.f32 %v1401_v43, %v815_v44  ;;  %v847_v47 = vmul.f32 %v815_v44, %v815_v44  ;;  %v810_v48 = vmul.f32 %v1403_v59, %v1403_v59  ;;  %1408 = vpow2.f32 %v799_v45 }
 0x17d   : > { %v1405_v49 = vpop.eup %1404 }
 0x17e   : > { %v863_v37 = vadd.f32 %v847_v47, %v831_v46  ;;  %v879_v50 = vmul.f32 %v847_v47, %v847_v47  ;;  %v826_v16 = vadd.f32 %v1403_v59, %v810_v48  ;;  %v842_v33 = vmul.f32 %v810_v48, %v810_v48 }
 0x17f   : > { %v818_v51 = vmul.f32 %v1405_v49, %v1405_v49 }
 0x180   : > { %v895_v17 = vadd.f32 %v879_v50, %v863_v37  ;;  %v911_v52 = vmul.f32 %v879_v50, %v879_v50  ;;  %v858_v36 = vadd.f32 %v842_v33, %v826_v16  ;;  %v874_v24 = vmul.f32 %v842_v33, %v842_v33 }
 0x181   : > { %v1407_v53 = vpop.eup %1406  ;;  %v834_v55 = vadd.f32 %v1405_v49, %v818_v51  ;;  %v850_v56 = vmul.f32 %v818_v51, %v818_v51 }
 0x182   : > { %v927_v57 = vadd.f32 %v911_v52, %v895_v17  ;;  %v890_v60 = vadd.f32 %v874_v24, %v858_v36  ;;  %v906_v61 = vmul.f32 %v874_v24, %v874_v24  ;;  %v809_v18 = vmul.f32 %v1407_v53, %v1407_v53 }
 0x183   : > { %v866_v62 = vadd.f32 %v850_v56, %v834_v55  ;;  %v882_v0 = vmul.f32 %v850_v56, %v850_v56 }
 0x184   : > { %943 = vst [vmem:[%s1861_s14 + $0x60] sm:$0xff] %v927_v57  ;;  %v922_v1 = vadd.f32 %v906_v61, %v890_v60  ;;  %v825_v2 = vadd.f32 %v1407_v53, %v809_v18  ;;  %v841_v3 = vmul.f32 %v809_v18, %v809_v18 }
 0x185   : > { %v898_v4 = vadd.f32 %v882_v0, %v866_v62  ;;  %v914_v5 = vmul.f32 %v882_v0, %v882_v0 }
 0x186   : > { %v1409_v6 = vpop.eup %1408  ;;  %938 = vst [vmem:[%s1861_s14 + $0x38] sm:$0xff] %v922_v1  ;;  %v857_v7 = vadd.f32 %v841_v3, %v825_v2  ;;  %v873_v8 = vmul.f32 %v841_v3, %v841_v3 }
 0x187   : > { %v930_v10 = vadd.f32 %v914_v5, %v898_v4  ;;  %v817_v11 = vmul.f32 %v1409_v6, %v1409_v6 }
 0x188   : > { %v889_v9 = vadd.f32 %v873_v8, %v857_v7  ;;  %v905_v12 = vmul.f32 %v873_v8, %v873_v8 }
 0x189   : > { %946 = vst [vmem:[%s1861_s14 + $0x78] sm:$0xff] %v930_v10  ;;  %v833_v14 = vadd.f32 %v1409_v6, %v817_v11  ;;  %v849_v15 = vmul.f32 %v817_v11, %v817_v11 }
 0x18a   : > { %v921_v19 = vadd.f32 %v905_v12, %v889_v9 }
 0x18b   : > { %v865_v20 = vadd.f32 %v849_v15, %v833_v14  ;;  %v881_v21 = vmul.f32 %v849_v15, %v849_v15 }
 0x18c   : > { %937 = vst [vmem:[%s1861_s14 + $0x30] sm:$0xff] %v921_v19 }
 0x18d   : > { %v897_v22 = vadd.f32 %v881_v21, %v865_v20  ;;  %v913_v23 = vmul.f32 %v881_v21, %v881_v21 }
 0x18f   : > { %v929_v25 = vadd.f32 %v913_v23, %v897_v22 }
 0x191   : > { %945 = vst [vmem:[%s1861_s14 + $0x70] sm:$0xff] %v929_v25 }
 0x192   : > { %1438 = shalt.err (!%p1435_p5)
}
 0x193   : > { %s1439_s12 = scalar_lea.hbm %s1892_s21, 2048  ;;  %s1443_s17 = scalar_lea.hbm %s1956_s5, 8192 }
 0x194   : > { %p1440_p6 = scmp.ne.s32.totalorder %s1892_s21, %s1439_s12  ;;  %p1444_p11 = scmp.lt.u32.totalorder %s1892_s21, %s1956_s5 }
 0x195   : > { %p1445_p13 = scmp.lt.u32.totalorder %s1443_s17, %s1439_s12  ;;  %p1447_p10 = scmp.lt.u32.totalorder %s1439_s12, %s1892_s21 }
 0x196   : > { %p1441_p7 = pnand %p1440_p6, %p1613_p3 }
 0x197   : > { %p1446_p8 = por %p1445_p13, %p1444_p11 }
 0x198   : > { %p1442_p9 = pneg %p1441_p7 }
 0x199   : > { %p1448_p12 = por %p1447_p10, %p1446_p8 }
 0x19b   : > { %p1449_p0 = pnand %p1448_p12, %p1442_p9 }
 0x19d   : > { %1452 = shalt.err (!%p1449_p0)
}
 0x19e   : > { %s1528_s30 = smov 128   ;;  %s1529_s9 = smov 256  }
 0x19f   : > { %s1530_s10 = smov 8  }
 0x1a0   : > { %1294 = dma.vmem_to_hbm [thread:$0]  (%p1613_p3), %s1894_s26, 2048, %s1892_s21, %s1899_s6, %s1528_s30, %s1529_s9, %s1530_s10  }
 0x1a1 PF: > { %p1306_p1 = scmp.ge.s32.totalorder %s1523_s25, 2  ;;  %s978_s11 = sand.u32 1, %s1495_s18  }
 0x1a2   : > { %p1963_p2 = scmp.ne.s32.totalorder %s1958_s8, 0  ;;  %s979_s13 = scalar_lea.sflag [#allocation3], %s978_s11 }
 0x1a4   : > { %p1301_p4 = pnand %p1306_p1, %p1963_p2 }
 0x1a6   : > { %1490 = dma.done.wait (!%p1301_p4), %s979_s13, 2048  }
 0x1a7   : > { %1492 = vsyncadd (!%p1301_p4), %s979_s13, 4294965248  ;;  %s19_s25 = sadd.s32 1, %s1523_s25   ;;  %s1964_s18 = smov %s1499_s19 }
 0x1a8   : > { %p16_p5 = scmp.ge.s32.totalorder %s19_s25, 6   ;;  %s1965_s19 = smov %s1503_s20 }
 0x1a9   : > { %s1966_s20 = smov %s1643_s16  ;;  %s1967_s21 = smov %s1515_s23 }
 0x1aa   : > { %s1968_s22 = smov %s1519_s24  ;;  %s1969_s23 = smov %s1972_s28 }
 0x1ab   : > { %s1970_s24 = smov %s1976_s29  ;;  %18 = sbr.rel (!%p16_p5) target bundleno = 6 (0x6), region = 89 }
 0x1b2   :  { %984 = vsyncpa [#allocation3], 1 }
 0x1b3   :  { %986 = vsyncpa [#allocation3 + $0x1], 1 }
 0x1b4   :  { %987 = vsyncpa [#allocation4], 1 }
 0x1b5   :  { %989 = vsyncpa [#allocation4 + $0x1], 1 }

</bundles_post_ra>
